<compile_context>
chip_gen: v6e
topology: v6e:2x2x1
jax: 0.10.0
libtpu: 0.0.40
codegen_flags: <defaults>
</compile_context>

<pallas_src>
import jax
import jax.numpy as jnp
from jax.experimental import pallas as pl
from jax.experimental.pallas import tpu as pltpu

_MIB = 1024 * 1024


# ------------------------------------------------------------------ kernels --

def _dot_align_batch_kernel(enc_ref, dec_ref, out_ref):
    # enc_ref: (BT, S, H), dec_ref: (BT, H), out_ref: (BT, S)
    enc = enc_ref[...].astype(jnp.float32)
    dec = dec_ref[...].astype(jnp.float32)
    scores = jnp.sum(enc * dec[:, None, :], axis=-1)          # (BT, S) f32
    out_ref[...] = scores.astype(out_ref.dtype)


def _dot_align_seq_kernel(enc_ref, dec_ref, out_ref):
    # enc_ref: (TS, H), dec_ref: (1, H), out_ref: (1, TS)
    # Contract the last dims (trans_b on the MXU) -- no physical transpose of
    # the big encoder tile through the XLU.
    scores = jax.lax.dot_general(
        dec_ref[...], enc_ref[...],
        dimension_numbers=(((1,), (1,)), ((), ())),
        preferred_element_type=jnp.float32)                   # (1, TS) f32
    out_ref[...] = scores.astype(out_ref.dtype)


def _dot_align_hsplit_kernel(enc_ref, dec_ref, out_ref, acc_ref):
    # enc_ref: (TS, TH), dec_ref: (1, TH), out_ref/acc_ref: (1, TS)
    k = pl.program_id(2)

    @pl.when(k == 0)
    def _():
        acc_ref[...] = jnp.zeros_like(acc_ref)

    acc_ref[...] += jax.lax.dot_general(
        dec_ref[...], enc_ref[...],
        dimension_numbers=(((1,), (1,)), ((), ())),
        preferred_element_type=jnp.float32)

    @pl.when(k == pl.num_programs(2) - 1)
    def _():
        out_ref[...] = acc_ref[...].astype(out_ref.dtype)


# ------------------------------------------------------------------ planning --

def _vmem_capacity_bytes():
    try:
        return int(pltpu.get_tpu_info().vmem_capacity_bytes)
    except Exception:
        return 64 * _MIB  # conservative default (v7x per-TC VMEM)


def _padded_block_bytes(shape, itemsize):
    """Estimate a block's VMEM footprint incl. (8, 128) sublane/lane padding."""
    dims = [int(d) for d in shape]
    if len(dims) >= 2:
        dims[-2] = -(-dims[-2] // 8) * 8
    dims[-1] = -(-dims[-1] // 128) * 128
    n = 1
    for d in dims:
        n *= d
    return n * itemsize


def _round_seq_tile(ts, S):
    if ts >= S:
        return S
    return max(128, (ts // 128) * 128)


# ------------------------------------------------------------------ wrapper ---

def dot_alignment(encoder_outputs, decoder_hidden_state,
                  *, seq_tile=None, batch_tile=None, h_tile=None):
    """Pallas implementation of DotAlignment.forward.

    encoder_outputs:      (B, S, H)
    decoder_hidden_state: (B, H)
    returns:              (B, S)

    seq_tile / batch_tile / h_tile are optional overrides (mainly for testing).
    """
    B, S, H = encoder_outputs.shape
    assert decoder_hidden_state.shape == (B, H), (
        "context_vector_size must equal encoder_output_size")

    dtype = encoder_outputs.dtype
    itemsize = jnp.dtype(dtype).itemsize
    row_bytes = H * itemsize
    per_batch_bytes = S * row_bytes

    # Per-generation VMEM budget: keep <= ~40 MiB scoped on 64 MiB/TC parts
    # (v7x), up to 64 MiB on 128 MiB parts (v5e/v6e).
    vmem_cap = _vmem_capacity_bytes()
    vmem_budget = min(vmem_cap * 5 // 8, 64 * _MIB)
    # Target encoder-tile size (double-buffered by the pipeline): ~8 MiB.
    target_bytes = min(8 * _MIB, vmem_budget // 4)

    cost = pl.CostEstimate(
        flops=2 * B * S * H,
        transcendentals=0,
        bytes_accessed=(B * S * H + B * H + B * S) * itemsize)

    forced_batch = batch_tile is not None
    forced_seq = (seq_tile is not None) or (h_tile is not None)
    use_batch = forced_batch or (
        not forced_seq and per_batch_bytes * 2 <= target_bytes)

    # ---------------------------------------------------------- batch path ---
    if use_batch:
        # Keep the f32 elementwise temporaries / vreg pressure bounded.
        batch_target = min(target_bytes, 4 * _MIB)
        if batch_tile is not None:
            bt = max(1, min(B, int(batch_tile)))
        else:
            bt = max(1, batch_target // max(per_batch_bytes, 1))
            # Keep the (bt, S) f32 result comfortably inside the vreg file.
            bt = min(bt, max(1, (128 * 1024) // max(S * 4, 1)))
            bt = min(bt, B)
            if bt >= 8:
                bt = (bt // 8) * 8  # unmasked sublane stores on the output

        needed = (2 * _padded_block_bytes((bt, S, H), itemsize)
                  + 2 * _padded_block_bytes((bt, H), itemsize)
                  + 2 * _padded_block_bytes((bt, S), itemsize)
                  + 2 * _padded_block_bytes((bt, S, H), 4))  # f32 temporaries
        vmem_limit = int(min(vmem_budget,
                             max(8 * _MIB, int(needed * 1.15) + _MIB)))

        return pl.pallas_call(
            _dot_align_batch_kernel,
            out_shape=jax.ShapeDtypeStruct((B, S), dtype),
            grid_spec=pltpu.PrefetchScalarGridSpec(
                num_scalar_prefetch=0,
                grid=(pl.cdiv(B, bt),),
                in_specs=[
                    pl.BlockSpec((bt, S, H), lambda b: (b, 0, 0)),
                    pl.BlockSpec((bt, H), lambda b: (b, 0)),
                ],
                out_specs=pl.BlockSpec((bt, S), lambda b: (b, 0)),
            ),
            compiler_params=pltpu.CompilerParams(
                dimension_semantics=("parallel",),
                vmem_limit_bytes=vmem_limit,
            ),
            cost_estimate=cost,
        )(encoder_outputs, decoder_hidden_state)

    # ----------------------------------------------------- H-split decision --
    need_hsplit = (h_tile is not None) or (row_bytes * 128 > target_bytes)
    if need_hsplit and H % 128 != 0:
        # TODO(synk): mask/pad the contraction remainder for non-128-multiple
        # huge H; fall back to the unsplit path for now.
        need_hsplit = False

    # ------------------------------------------------------ sequence-tiled ---
    if not need_hsplit:
        if seq_tile is not None:
            ts = _round_seq_tile(int(seq_tile), S)
        elif per_batch_bytes <= target_bytes:
            ts = S  # whole sequence in one block: no remainder, no masking
        else:
            ts = (target_bytes // max(row_bytes, 1)) // 128 * 128
            ts = _round_seq_tile(int(max(128, min(4096, ts))), S)

        needed = (2 * _padded_block_bytes((ts, H), itemsize)
                  + 2 * _padded_block_bytes((1, H), itemsize)
                  + 2 * _padded_block_bytes((1, ts), itemsize))
        vmem_limit = int(min(vmem_budget,
                             max(8 * _MIB, int(needed * 1.15) + _MIB)))

        return pl.pallas_call(
            _dot_align_seq_kernel,
            out_shape=jax.ShapeDtypeStruct((B, S), dtype),
            grid_spec=pltpu.PrefetchScalarGridSpec(
                num_scalar_prefetch=0,
                grid=(B, pl.cdiv(S, ts)),
                in_specs=[
                    # Encoder tile: batch dim squeezed -> kernel sees (TS, H).
                    pl.BlockSpec((pl.Squeezed(), ts, H), lambda b, s: (b, s, 0)),
                    # Decoder vector: constant block across S => VMEM-resident.
                    pl.BlockSpec((1, H), lambda b, s: (b, 0)),
                ],
                out_specs=pl.BlockSpec((1, ts), lambda b, s: (b, s)),
            ),
            compiler_params=pltpu.CompilerParams(
                dimension_semantics=("parallel", "parallel"),
                vmem_limit_bytes=vmem_limit,
            ),
            cost_estimate=cost,
        )(encoder_outputs, decoder_hidden_state)

    # ----------------------------------------------------------- H-split -----
    if h_tile is not None:
        th = max(128, (int(h_tile) // 128) * 128)
    else:
        th = (target_bytes // max(128 * itemsize, 1)) // 128 * 128
        th = max(128, min(int(th), H))
    th = min(th, H)
    while H % th != 0:   # contraction blocks must tile H exactly (no masking)
        th -= 128

    if seq_tile is not None:
        ts = _round_seq_tile(int(seq_tile), S)
    else:
        ts = (target_bytes // max(th * itemsize, 1)) // 128 * 128
        ts = _round_seq_tile(int(max(128, min(4096, ts))), S)

    needed = (2 * _padded_block_bytes((ts, th), itemsize)
              + 2 * _padded_block_bytes((1, th), itemsize)
              + 2 * _padded_block_bytes((1, ts), itemsize)
              + _padded_block_bytes((1, ts), 4))
    vmem_limit = int(min(vmem_budget,
                         max(8 * _MIB, int(needed * 1.15) + _MIB)))

    return pl.pallas_call(
        _dot_align_hsplit_kernel,
        out_shape=jax.ShapeDtypeStruct((B, S), dtype),
        grid_spec=pltpu.PrefetchScalarGridSpec(
            num_scalar_prefetch=0,
            grid=(B, pl.cdiv(S, ts), H // th),
            in_specs=[
                pl.BlockSpec((pl.Squeezed(), ts, th), lambda b, s, k: (b, s, k)),
                pl.BlockSpec((1, th), lambda b, s, k: (b, k)),
            ],
            out_specs=pl.BlockSpec((1, ts), lambda b, s, k: (b, s)),
            scratch_shapes=[pltpu.VMEM((1, ts), jnp.float32)],
        ),
        compiler_params=pltpu.CompilerParams(
            dimension_semantics=("parallel", "parallel", "arbitrary"),
            vmem_limit_bytes=vmem_limit,
        ),
        cost_estimate=cost,
    )(encoder_outputs, decoder_hidden_state)


# -------------------------------------------------------------------- main ---

if __name__ == "__main__":
    key = jax.random.PRNGKey(0)

    def _check(B, S, H, **kw):
        k1, k2 = jax.random.split(jax.random.fold_in(key, B * 100003 + S * 131 + H))
        enc = jax.random.normal(k1, (B, S, H), dtype=jnp.float32)
        dec = jax.random.normal(k2, (B, H), dtype=jnp.float32)
        out = jax.block_until_ready(dot_alignment(enc, dec, **kw))
        ref = jnp.einsum("bsh,bh->bs", enc, dec)
        assert out.shape == (B, S)
        assert jnp.allclose(out, ref, atol=1e-4, rtol=1e-4), (
            f"mismatch for shape ({B},{S},{H}) with {kw}")
        return out

    # Small shapes implied by the module (batch-blocked path).
    _check(2, 8, 32)
    # Sequence-tiled path with a remainder tile (masked lane write-back).
    _check(2, 320, 256, seq_tile=128)
    # Contraction-split path (f32 scratch accumulator across the H grid axis).
    _check(2, 256, 384, seq_tile=128, h_tile=128)

    print("KERNEL_OK")
</pallas_src>

<mosaic_0001>
module attributes {stable_mosaic.version = 11 : i64} {
  func.func @_dot_align_batch_kernel(%arg0: i32, %arg1: memref<2x8x32xf32, #tpu.memory_space<vmem>>, %arg2: memref<2x32xf32, #tpu.memory_space<vmem>>, %arg3: memref<2x8xf32, #tpu.memory_space<vmem>>) attributes {dimension_semantics = [#tpu.dimension_semantics<parallel>], iteration_bounds = array<i64: 1>, scalar_prefetch = 0 : i64, scratch_operands = 0 : i64, tpu.core_type = #tpu.core_type<tc>, window_params = [{transform_indices = @transform_0, window_bounds = array<i64: 2, 8, 32>}, {transform_indices = @transform_1, window_bounds = array<i64: 2, 32>}, {transform_indices = @transform_2, window_bounds = array<i64: 2, 8>}]} {
    %c0 = arith.constant 0 : index
    %c0_0 = arith.constant 0 : index
    %c0_1 = arith.constant 0 : index
    %0 = vector.load %arg1[%c0, %c0_0, %c0_1] : memref<2x8x32xf32, #tpu.memory_space<vmem>>, vector<2x8x32xf32>
    %c0_2 = arith.constant 0 : index
    %c0_3 = arith.constant 0 : index
    %1 = vector.load %arg2[%c0_2, %c0_3] : memref<2x32xf32, #tpu.memory_space<vmem>>, vector<2x32xf32>
    %2 = vector.shape_cast %1 : vector<2x32xf32> to vector<2x1x32xf32>
    %3 = vector.broadcast %2 : vector<2x1x32xf32> to vector<2x8x32xf32>
    %4 = arith.mulf %0, %3 : vector<2x8x32xf32>
    %cst = arith.constant dense<0.000000e+00> : vector<2x8xf32>
    %5 = vector.multi_reduction <add>, %4, %cst [2] : vector<2x8x32xf32> to vector<2x8xf32>
    %c0_4 = arith.constant 0 : index
    %c0_5 = arith.constant 0 : index
    %6 = vector.load %arg3[%c0_4, %c0_5] : memref<2x8xf32, #tpu.memory_space<vmem>>, vector<2x8xf32>
    tpu.vector_store %arg3[%c0_4, %c0_5], %5 {strides = array<i32>} : memref<2x8xf32, #tpu.memory_space<vmem>>, vector<2x8xf32>,
    return
  }
  func.func @transform_0(%arg0: i32) -> (i32, i32, i32) {
    %c0_i32 = arith.constant 0 : i32
    %c0_i32_0 = arith.constant 0 : i32
    %c0_i32_1 = arith.constant 0 : i32
    return %arg0, %c0_i32, %c0_i32_0 : i32, i32, i32
  }
  func.func @transform_1(%arg0: i32) -> (i32, i32) {
    %c0_i32 = arith.constant 0 : i32
    %c0_i32_0 = arith.constant 0 : i32
    return %arg0, %c0_i32 : i32, i32
  }
  func.func @transform_2(%arg0: i32) -> (i32, i32) {
    %c0_i32 = arith.constant 0 : i32
    %c0_i32_0 = arith.constant 0 : i32
    return %arg0, %c0_i32 : i32, i32
  }
}

</mosaic_0001>

<bundles_post_ra>
// kernel: tpu_custom_call.1
= control target key start
LH: loop header
LB: loop body
LE: loop exit
PB: predicated region body
PF: predicated region fallthrough
CT: control target
= control target key end

     0   :  { %7 = vsyncpa [#allocation3], 0  ;;  %s219_s0 = inlined_call_operand.hbm [shape: f32[2,8,32], index: 0, kind: input, shape index: {}]   ;;  %s220_s1 = inlined_call_operand.hbm [shape: f32[2,32], index: 1, kind: input, shape index: {}]   ;;  %s221_s2 = inlined_call_operand.hbm [shape: f32[2,8], index: 2, kind: output, shape index: {}]  }
   0x1   :  { %8 = vsyncpa [#allocation6], 0 }
   0x2   :  { %9 = vsyncpa [#allocation4], 0  ;;  %s189_s9 = smov [#allocation2]  }
   0x3   :  { %s15_s10 = sshll.u32 %s189_s9, 4  ;;  %s16_s10 = int_to_ptr.vmem [resolvable:$true] %s15_s10 }
   0x4   :  { %s131_s11 = scalar_lea.vmem %s16_s10, 256  ;;  %p136_p1 = scmp.lt.s32.totalorder %s16_s10, %s16_s10 }
   0x5   :  { %p132_p0 = scmp.ne.s32.totalorder %s16_s10, %s131_s11  ;;  %p137_p2 = scmp.lt.s32.totalorder %s131_s11, %s131_s11 }
   0x7   :  { %p138_p3 = por %p137_p2, %p136_p1 }
   0x9   :  { %p139_p4 = pnand %p138_p3, %p132_p0 }
   0xb   :  { %142 = shalt.err (!%p139_p4)
}
   0xc   :  { %s190_s12 = smov 128   ;;  %s191_s13 = smov 8  }
   0xd   :  { %21 = dma.hbm_to_vmem [thread:$0]  %s219_s0, 256, %s16_s10, [#allocation3], %s190_s12, %s190_s12, %s191_s13  }
   0xe   :  { %s192_s16 = smov [#allocation5]  }
   0xf   :  { %s28_s17 = sshll.u32 %s192_s16, 4  ;;  %s29_s17 = int_to_ptr.vmem [resolvable:$true] %s28_s17 }
  0x10   :  { %s151_s18 = scalar_lea.vmem %s29_s17, 32  ;;  %p156_p6 = scmp.lt.s32.totalorder %s29_s17, %s29_s17 }
  0x11   :  { %p152_p5 = scmp.ne.s32.totalorder %s29_s17, %s151_s18  ;;  %p157_p7 = scmp.lt.s32.totalorder %s151_s18, %s151_s18 }
  0x13   :  { %p158_p8 = por %p157_p7, %p156_p6 }
  0x15   :  { %p159_p9 = pnand %p158_p8, %p152_p5 }
  0x17   :  { %162 = shalt.err (!%p159_p9)
}
  0x18   :  { %31 = dma.hbm_to_vmem [thread:$0]  %s220_s1, 32, %s29_s17, [#allocation6]  }
  0x19   :  { %183 = dma.done.wait [#allocation3], 256  }
  0x1a   :  { %184 = vsyncadd [#allocation3], 4294967040 }
  0x1b   :  { %185 = dma.done.wait [#allocation6], 32  }
  0x1c   :  { %186 = vsyncadd [#allocation6], 4294967264  ;;  %v53_v0 = vlaneseq  ;;  %v193_v1 = vmov 1966171168   ;;  %v38_v12 = vld [vmem:[#allocation2] sm:$0xff]  ;;  %vm76_vm0 = vcmask 261120  }
  0x1d   :  { %v51_v2 = vunpack.c.l.s4 %v193_v1  ;;  %v116_v9 = vld.sshfl [vmem:[#allocation5] sm:$0x11 pattern:$0x75316420]  ;;  %v39_v15 = vld [vmem:[#allocation2 + $0x8] sm:$0xff]  ;;  %s194_s0 = smov [#allocation7]  }
  0x1e   :  { %v54_v3 = vshrl.u32 %v53_v0, 7  ;;  %v86_v4 = vand.u32 127, %v53_v0  ;;  %v49_v10 = vcombine.high %v116_v9, %v116_v9  ;;  %s106_s1 = sshll.u32 %s194_s0, 4  ;;  %vm95_vm1 = vcmask 1041409   ;;  %s107_s1 = int_to_ptr.vmem [resolvable:$true] %s106_s1 }
  0x1f   :  { %v52_v5 = vunpack.c.0.s8 %v51_v2  ;;  %vm98_vm2 = vcmask 58368   ;;  %s163_s21 = scalar_lea.vmem %s107_s1, 32  ;;  %p168_p11 = scmp.lt.s32.totalorder %s107_s1, %s107_s1 }
  0x20   :  { %v89_v6 = vsub.s32 %v86_v4, %v54_v3  ;;  %v66_v8 = vsub.s32 0, %v54_v3  ;;  %p164_p10 = scmp.ne.s32.totalorder %s107_s1, %s163_s21  ;;  %p169_p12 = scmp.lt.s32.totalorder %s163_s21, %s163_s21 }
  0x21   :  { %v55_v7 = vsub.s32 %v52_v5, %v54_v3 }
  0x22   :  { %p170_p13 = por %p169_p12, %p168_p11 }
  0x23   :  { %v56_v11 = vrot.slane %v116_v9, %v55_v7  ;;  %v63_v14 = vrot.slane %v49_v10, %v55_v7 }
  0x24   :  { %p171_p0 = pnand %p170_p13, %p164_p10 }
  0x25   :  { %v67_v13 = vrot.slane %v56_v11, %v66_v8  ;;  %v71_v17 = vrot.slane %v63_v14, %v66_v8 }
  0x27   :  { %v74_v16 = vmul.f32 %v67_v13, %v38_v12  ;;  %v75_v19 = vmul.f32 %v71_v17, %v39_v15 }
  0x29   :  { %v77_v18 = vsel %vm76_vm0, %v74_v16, 0.0  ;;  %v80_v20 = vsel %vm76_vm0, %v75_v19, 0.0 }
  0x2a   :  { %78 = vadd.xlane.f32.xlu0 %v77_v18 }
  0x2e   :  { %81 = vadd.xlane.f32.xlu0 %v80_v20 }
  0xb3   :  { %v79_v21 = vpop.xlane.xlu0 %78 }
  0xb4   :  { %v90_v23 = vrot.slane %v79_v21, %v89_v6 }
  0xb7   :  { %v82_v22 = vpop.xlane.xlu0 %81 }
  0xb8   :  { %v94_v24 = vrot.slane %v82_v22, %v89_v6 }
  0xba   :  { %v96_v25 = vsel %vm95_vm1, %v94_v24, %v90_v23 }
  0xbb   :  { %99 = vst.msk [vmem:[#allocation7] sm:$0x3] %vm98_vm2, %v96_v25 }
  0xbc   :  { %174 = shalt.err (!%p171_p0)
}
  0xbd   :  { %109 = dma.vmem_to_hbm [thread:$0]  %s107_s1, 32, %s221_s2, [#allocation4]  }
  0xbe   :  { %187 = dma.done.wait [#allocation4], 32  }
  0xbf   :  { %188 = vsyncadd [#allocation4], 4294967264 }
  0xc0   :  { %113 = vsyncpa [#allocation3], 1 }
  0xc1   :  { %114 = vsyncpa [#allocation6], 1 }
  0xc2   :  { %115 = vsyncpa [#allocation4], 1 }

</bundles_post_ra>
